<compile_context>
chip_gen: v7x
topology: tpu7x:2x2x1
jax: 0.10.0
libtpu: 0.0.40
codegen_flags: <defaults>
</compile_context>

<pallas_src>
import functools

import jax
import jax.numpy as jnp
from jax import lax
from jax.experimental import pallas as pl
from jax.experimental.pallas import tpu as pltpu


# Target per-step VMEM footprint (double-buffered in/out blocks + scratch).
_VMEM_TARGET_BYTES = 24 * 1024 * 1024
# Requested scoped-VMEM limit: > v5e's 16 MiB default, < v7x's 64 MiB physical.
_VMEM_LIMIT_BYTES = 48 * 1024 * 1024


# ---------------------------------------------------------------------------
# 1-D interpolation matrix (PyTorch 'bilinear', align_corners=False)
# ---------------------------------------------------------------------------
def _interp_matrix(in_size: int, out_size: int) -> jnp.ndarray:
    """Rows = output index, cols = input index; each row holds the two
    half-pixel linear-interpolation weights used by PyTorch (align_corners=False)."""
    scale = in_size / out_size
    dst = jnp.arange(out_size, dtype=jnp.float32)
    src = (dst + 0.5) * scale - 0.5
    src = jnp.maximum(src, 0.0)                     # PyTorch clamps negatives to 0
    i0 = jnp.minimum(jnp.floor(src).astype(jnp.int32), in_size - 1)
    i1 = jnp.minimum(i0 + 1, in_size - 1)
    frac = src - i0.astype(jnp.float32)
    rows = jnp.arange(out_size)
    m = jnp.zeros((out_size, in_size), jnp.float32)
    m = m.at[rows, i0].add(1.0 - frac)
    m = m.at[rows, i1].add(frac)                    # i0 == i1 at the border -> weight 1
    return m


# ---------------------------------------------------------------------------
# Kernel: TB (H, W) slices -> TB (OH, OW) slices via separable MXU matmuls
# ---------------------------------------------------------------------------
def _upsample_block_kernel(x_ref, awt_ref, ah_ref, o_ref, t_ref):
    """x_ref:(TB,H,W)  awt_ref:(W,OW)  ah_ref:(OH,H)  o_ref:(TB,OH,OW)  t_ref:(TB,H,OW)."""
    TB, H, W = x_ref.shape
    OW = awt_ref.shape[1]

    # --- W direction: one big MXU matmul. Merging (TB,H) keeps W as lane dim. ---
    t = jnp.dot(x_ref[...].reshape(TB * H, W), awt_ref[...],
                preferred_element_type=jnp.float32)            # (TB*H, OW), f32 acc
    t_ref[...] = t.reshape(TB, H, OW).astype(t_ref.dtype)

    # --- H direction: per-slice (OH,H)@(H,OW) matmuls.  A batched einsum here
    # would need a non-standard dot_general / transpose; a fori_loop of plain
    # 2-D dots always lowers, and the kernel is HBM-bound so compute is hidden.
    ah = ah_ref[...]

    def body(b, carry):
        o_ref[b] = jnp.dot(ah, t_ref[b],
                           preferred_element_type=jnp.float32).astype(o_ref.dtype)
        return carry

    lax.fori_loop(0, TB, body, 0)


# ---------------------------------------------------------------------------
# Wrapper
# ---------------------------------------------------------------------------
def upsample_bilinear(x_nchw, scale: int = 2):
    """PyTorch nn.Upsample(mode='bilinear', scale_factor=scale) forward.

    x_nchw: (N, C, H, W) -> (N, C, scale*H, scale*W), same dtype as input.
    """
    N, C, H, W = x_nchw.shape
    OH, OW = H * scale, W * scale
    B = N * C

    x_isz = jnp.dtype(x_nchw.dtype).itemsize
    # bf16 inputs keep bf16 operands on the MXU (f32 accumulation); otherwise f32.
    cdt = jnp.bfloat16 if x_nchw.dtype == jnp.bfloat16 else jnp.float32
    c_isz = jnp.dtype(cdt).itemsize

    # Per-slice VMEM: double-buffered input + output blocks + intermediate scratch.
    per_slice = (2 * H * W + 2 * OH * OW) * x_isz + H * OW * c_isz
    tb = max(1, _VMEM_TARGET_BYTES // per_slice)
    tb = min(tb, B)
    nblocks = -(-B // tb)                     # cdiv
    if B > 1 and nblocks == 1:
        nblocks = 2                           # let both v7x TensorCores work
    if nblocks > 1 and nblocks % 2 == 1:
        nblocks += 1                          # even grid splits cleanly across 2 TCs
    tb = -(-B // nblocks)
    bp = tb * nblocks
    # TODO(synk): for very large H*W where even tb==1 exceeds the VMEM target,
    # add an inner grid axis over OH row-blocks (x's index_map independent of it)
    # instead of shrinking the batch block further.

    ah = _interp_matrix(H, OH).astype(cdt)    # (OH, H)  — VMEM-resident
    awt = _interp_matrix(W, OW).T.astype(cdt)  # (W, OW) — VMEM-resident

    xb = x_nchw.reshape(B, H, W)
    if bp > B:
        xb = jnp.pad(xb, ((0, bp - B), (0, 0), (0, 0)))

    flops = bp * (2 * OH * H * W + 2 * OH * W * OW)
    bytes_accessed = x_isz * bp * (H * W + OH * OW) + c_isz * (OH * H + W * OW)

    out = pl.pallas_call(
        _upsample_block_kernel,
        out_shape=jax.ShapeDtypeStruct((bp, OH, OW), x_nchw.dtype),
        grid=(nblocks,),
        in_specs=[
            pl.BlockSpec((tb, H, W), lambda i: (i, 0, 0)),   # block i of the slices
            pl.BlockSpec((W, OW), lambda i: (0, 0)),         # resident across grid
            pl.BlockSpec((OH, H), lambda i: (0, 0)),         # resident across grid
        ],
        out_specs=pl.BlockSpec((tb, OH, OW), lambda i: (i, 0, 0)),
        scratch_shapes=[pltpu.VMEM((tb, H, OW), cdt)],
        compiler_params=pltpu.CompilerParams(
            dimension_semantics=("parallel",),               # shard blocks across TCs
            vmem_limit_bytes=_VMEM_LIMIT_BYTES,
        ),
        cost_estimate=pl.CostEstimate(
            flops=flops, transcendentals=0, bytes_accessed=bytes_accessed),
    )(xb, awt, ah)

    return out[:B].reshape(N, C, OH, OW)


# ---------------------------------------------------------------------------
if __name__ == "__main__":
    key = jax.random.PRNGKey(0)
    N, C, H, W = 2, 4, 16, 16
    scale = 2

    x = jax.random.normal(key, (N, C, H, W), jnp.float32)

    fwd = jax.jit(functools.partial(upsample_bilinear, scale=scale))
    out = fwd(x)
    jax.block_until_ready(out)

    assert out.shape == (N, C, scale * H, scale * W), out.shape
    assert out.dtype == x.dtype, out.dtype

    # Cross-check the Pallas result against the same separable interpolation
    # computed with plain XLA (validates kernel plumbing + BlockSpecs).
    ah = _interp_matrix(H, scale * H)
    aw = _interp_matrix(W, scale * W)
    ref = jnp.einsum("oh,nchw,pw->ncop", ah, x, aw)
    max_err = float(jnp.max(jnp.abs(out - ref)))
    assert jnp.allclose(out, ref, rtol=1e-5, atol=1e-5), max_err

    print("KERNEL_OK")
</pallas_src>

<mosaic_0001>
module attributes {stable_mosaic.version = 11 : i64} {
  func.func private @main(%arg0: i32) attributes {dimension_semantics = [#tpu.dimension_semantics<core_parallel>], iteration_bounds = array<i64: 2>, tpu.core_type = #tpu.core_type<sc_scalar_subcore>, window_params = []} {
    return
  }
}

module attributes {stable_mosaic.version = 11 : i64} {
  func.func private @main(%arg0: i32) attributes {dimension_semantics = [#tpu.dimension_semantics<core_parallel>], iteration_bounds = array<i64: 2>, tpu.core_type = #tpu.core_type<sc_scalar_subcore>, window_params = []} {
    return
  }
}

module attributes {stable_mosaic.version = 11 : i64} {
  func.func @_upsample_block_kernel(%arg0: i32, %arg1: memref<4x16x16xf32, #tpu.memory_space<vmem>>, %arg2: memref<16x32xf32, #tpu.memory_space<vmem>>, %arg3: memref<32x16xf32, #tpu.memory_space<vmem>>, %arg4: memref<4x32x32xf32, #tpu.memory_space<vmem>>, %arg5: memref<4x16x32xf32, #tpu.memory_space<vmem>>) attributes {dimension_semantics = [#tpu.dimension_semantics<parallel>], iteration_bounds = array<i64: 2>, scalar_prefetch = 0 : i64, scratch_operands = 1 : i64, tpu.core_type = #tpu.core_type<tc>, window_params = [{transform_indices = @transform_0, window_bounds = array<i64: 4, 16, 16>}, {pipeline_mode = #tpu.pipeline_mode<synchronous>, transform_indices = @transform_1, window_bounds = array<i64: 16, 32>}, {pipeline_mode = #tpu.pipeline_mode<synchronous>, transform_indices = @transform_2, window_bounds = array<i64: 32, 16>}, {transform_indices = @transform_3, window_bounds = array<i64: 4, 32, 32>}]} {
    %c0 = arith.constant 0 : index
    %c0_0 = arith.constant 0 : index
    %c0_1 = arith.constant 0 : index
    %0 = vector.load %arg1[%c0, %c0_0, %c0_1] : memref<4x16x16xf32, #tpu.memory_space<vmem>>, vector<4x16x16xf32>
    %1 = vector.shape_cast %0 : vector<4x16x16xf32> to vector<64x16xf32>
    %c0_2 = arith.constant 0 : index
    %c0_3 = arith.constant 0 : index
    %2 = vector.load %arg2[%c0_2, %c0_3] : memref<16x32xf32, #tpu.memory_space<vmem>>, vector<16x32xf32>
    %cst = arith.constant dense<0.000000e+00> : vector<64x32xf32>
    %3 = tpu.matmul %1, %2, %cst {dimension_numbers = #tpu.dot_dimension_numbers<[1], [0], [0], [1], [0, 0, 1, 1], [], []>} : vector<64x16xf32>, vector<16x32xf32>, vector<64x32xf32> -> vector<64x32xf32>
    %4 = vector.shape_cast %3 : vector<64x32xf32> to vector<4x16x32xf32>
    %c0_4 = arith.constant 0 : index
    %c0_5 = arith.constant 0 : index
    %c0_6 = arith.constant 0 : index
    %5 = vector.load %arg5[%c0_4, %c0_5, %c0_6] : memref<4x16x32xf32, #tpu.memory_space<vmem>>, vector<4x16x32xf32>
    tpu.vector_store %arg5[%c0_4, %c0_5, %c0_6], %4 {strides = array<i32>} : memref<4x16x32xf32, #tpu.memory_space<vmem>>, vector<4x16x32xf32>,
    %c0_7 = arith.constant 0 : index
    %c0_8 = arith.constant 0 : index
    %6 = vector.load %arg3[%c0_7, %c0_8] : memref<32x16xf32, #tpu.memory_space<vmem>>, vector<32x16xf32>
    %c0_i32 = arith.constant 0 : i32
    %c4_i32 = arith.constant 4 : i32
    %7 = arith.addi %c0_i32, %c4_i32 : i32
    %c1_i32 = arith.constant 1 : i32
    scf.for %arg6 = %c0_i32 to %7 step %c1_i32  : i32 {
      %8 = arith.index_cast %arg6 : i32 to index
      %c0_10 = arith.constant 0 : index
      %c0_11 = arith.constant 0 : index
      %9 = vector.load %arg5[%8, %c0_10, %c0_11] : memref<4x16x32xf32, #tpu.memory_space<vmem>>, vector<1x16x32xf32>
      %10 = vector.shape_cast %9 : vector<1x16x32xf32> to vector<16x32xf32>
      %cst_12 = arith.constant dense<0.000000e+00> : vector<32x32xf32>
      %11 = tpu.matmul %6, %10, %cst_12 {dimension_numbers = #tpu.dot_dimension_numbers<[1], [0], [0], [1], [0, 0, 1, 1], [], []>} : vector<32x16xf32>, vector<16x32xf32>, vector<32x32xf32> -> vector<32x32xf32>
      %12 = arith.index_cast %arg6 : i32 to index
      %c0_13 = arith.constant 0 : index
      %c0_14 = arith.constant 0 : index
      %13 = vector.load %arg4[%12, %c0_13, %c0_14] : memref<4x32x32xf32, #tpu.memory_space<vmem>>, vector<1x32x32xf32>
      %14 = vector.shape_cast %13 : vector<1x32x32xf32> to vector<32x32xf32>
      %15 = vector.shape_cast %11 : vector<32x32xf32> to vector<1x32x32xf32>
      tpu.vector_store %arg4[%12, %c0_13, %c0_14], %15 {strides = array<i32>} : memref<4x32x32xf32, #tpu.memory_space<vmem>>, vector<1x32x32xf32>,
    }
    %c4_i32_9 = arith.constant 4 : i32
    return
  }
  func.func @transform_0(%arg0: i32) -> (i32, i32, i32) {
    %c0_i32 = arith.constant 0 : i32
    %c0_i32_0 = arith.constant 0 : i32
    %c0_i32_1 = arith.constant 0 : i32
    return %arg0, %c0_i32, %c0_i32_0 : i32, i32, i32
  }
  func.func @transform_1(%arg0: i32) -> (i32, i32) {
    %c0_i32 = arith.constant 0 : i32
    %c0_i32_0 = arith.constant 0 : i32
    %c0_i32_1 = arith.constant 0 : i32
    return %c0_i32, %c0_i32_0 : i32, i32
  }
  func.func @transform_2(%arg0: i32) -> (i32, i32) {
    %c0_i32 = arith.constant 0 : i32
    %c0_i32_0 = arith.constant 0 : i32
    %c0_i32_1 = arith.constant 0 : i32
    return %c0_i32, %c0_i32_0 : i32, i32
  }
  func.func @transform_3(%arg0: i32) -> (i32, i32, i32) {
    %c0_i32 = arith.constant 0 : i32
    %c0_i32_0 = arith.constant 0 : i32
    %c0_i32_1 = arith.constant 0 : i32
    return %arg0, %c0_i32, %c0_i32_0 : i32, i32, i32
  }
}

</mosaic_0001>

<bundles_post_ra>
// kernel: upsample_bilinear.1
= control target key start
LH: loop header
LB: loop body
LE: loop exit
PB: predicated region body
PF: predicated region fallthrough
CT: control target
= control target key end

     0   :  { %8 = vsyncpa [#allocation4], 0  ;;  %s916_s0 = inlined_call_operand.vmem [shape: f32[8,16,16], index: 0, kind: input, shape index: {}]   ;;  %s917_s1 = inlined_call_operand.vmem [shape: f32[16,32], index: 1, kind: input, shape index: {}]   ;;  %s918_s2 = inlined_call_operand.vmem [shape: f32[32,16], index: 2, kind: input, shape index: {}]   ;;  %s919_s3 = inlined_call_operand.hbm [shape: f32[8,32,32], index: 3, kind: output, shape index: {}]  }
   0x1   :  { %10 = vsyncpa [#allocation4 + $0x1], 0  ;;  %s756_s12 = smov 0   ;;  %s758_s13 = smov 0  }
   0x2   :  { %s760_s14 = smov 0   ;;  %s762_s15 = smov 0  }
   0x3 LB: > { %s777_s16 = sadd.s32 4294967295, %s727_s15   ;;  %s527_s17 = sadd.s32 4294967294, %s727_s15   ;;  %s727_s15 = sphi %s762_s15, %s925_s15   ;;  %s723_s14 = sphi %s760_s14, %s924_s14   ;;  %s719_s13 = sphi %s758_s13, %s923_s13   ;;  %s715_s12 = sphi %s756_s12, %s922_s12  }
   0x4   : > { %s781_s18 = sadd.s32 1, %s727_s15   ;;  %s91_s19 = sadd.s32 1, %s723_s14 }
   0x5   : > { %s88_s20 = ssub.s32 %s727_s15, %s781_s18  ;;  %p101_p0 = scmp.ne.s32.totalorder %s723_s14, %s719_s13 }
   0x6   : > { %p89_p1 = scmp.eq.s32.totalorder %s88_s20, 0  ;;  %p102_p2 = scmp.eq.s32.totalorder %s777_s16, 1 }
   0x7   : > { %p107_p3 = scmp.ne.s32.totalorder %s719_s13, %s715_s12  ;;  %p108_p4 = scmp.eq.s32.totalorder %s527_s17, 1 }
   0x8   : > { %s792_s21 = scalar_select %p89_p1, %s723_s14, %s91_s19  }
   0x9   : > { %p794_p5 = por %p102_p2, %p101_p0  ;;  %p798_p6 = por %p108_p4, %p107_p3 }
   0xa   : > { %p530_p7 = scmp.ge.s32.totalorder %s727_s15, 1  ;;  %p142_p8 = scmp.lt.s32.totalorder %s727_s15, 3 }
   0xc   : > { %p143_p9 = pnand %p530_p7, %p142_p8 }
   0xd   : > { %s164_s24 = sand.u32 (!%p143_p9), 1, %s719_s13   ;;  %v183_v0 = vld [vmem:[%s917_s1] sm:$0xff] (!%p143_p9)  ;;  %v184_v1 = vld [vmem:[%s917_s1 + $0x8] sm:$0xff] (!%p143_p9)  ;;  %s532_s29 = sshll.u32 (!%p143_p9), %s777_s16, 2  ;;  %vm185_vm0 = vcmask (!%p143_p9), 130048   ;;  %v326_v13 = vld [vmem:[%s918_s2 + $0x10] sm:$0xff] (!%p143_p9) }
   0xe   : > { %146 = sbr.rel (%p143_p9) target bundleno = 486 (0x1e6), region = 32  ;;  %s814_s30 = sshll.u32 (!%p143_p9), %s164_s24, 7  ;;  %v600_v2 = vpack.c.bf16 (!%p143_p9), %v184_v1, %v183_v0  ;;  %v324_v11 = vld [vmem:[%s918_s2] sm:$0xff] (!%p143_p9)  ;;  %v325_v12 = vld [vmem:[%s918_s2 + $0x8] sm:$0xff] (!%p143_p9)  ;;  %v327_v14 = vld [vmem:[%s918_s2 + $0x18] sm:$0xff] (!%p143_p9)  ;;  %vm315_vm1 = vcmask (!%p143_p9), 261120  }
   0xf   : > { %p168_p10 = scmp.lt.s32.totalorder (!%p143_p9), %s532_s29, 7  ;;  %s166_s26 = scalar_lea.vmem (!%p143_p9), [#allocation3], %s814_s30 }
  0x10   : > { %601 = vmatprep.subr.bf16.mxu0 (!%p143_p9), %v600_v2  ;;  %608 = vmatprep.subr.bf16.mxu1 (!%p143_p9), %v600_v2  ;;  %s848_s27 = smov (!%p143_p9), 0  }
  0x11   : > { %603 = vmatpush3.bf16.msra.mxu0 (!%p143_p9), %v600_v2  ;;  %609 = vmatpush3.bf16.msra.mxu1 (!%p143_p9), %v600_v2 }
  0x15   : > { %s927_s29 = smov (!%p168_p10, %s532_s29), 7 }
  0x16   : > { %s555_s4 = sshll.u32 %s927_s29, 4 }
  0x17   : > { %s172_s7 = scalar_lea.vmem %s916_s0, %s555_s4 }
  0x18   : > { %v175_v3 = vld [vmem:[%s172_s7] sm:$0xff]  ;;  %v176_v5 = vld [vmem:[%s172_s7 + $0x8] sm:$0xff]  ;;  %v177_v7 = vld [vmem:[%s172_s7 + $0x10] sm:$0xff] }
  0x19   : > { %v179_v4 = vld [vmem:[%s172_s7 + $0x20] sm:$0xff]  ;;  %578 = vmatprep.mubr.msk.f32.mxu0 %vm185_vm0, %v175_v3  ;;  %v180_v6 = vld [vmem:[%s172_s7 + $0x28] sm:$0xff]  ;;  %v181_v8 = vld [vmem:[%s172_s7 + $0x30] sm:$0xff] }
  0x1a   : > { %584 = vmatprep.mubr.msk.f32.mxu1 %vm185_vm0, %v179_v4  ;;  %579 = vmatmul.mubr.msk.f32.vlgmr.msra.gmra.mrb[0].mxu0 %vm185_vm0, %v176_v5  ;;  %v178_v9 = vld [vmem:[%s172_s7 + $0x18] sm:$0xff] }
  0x1b   : > { %585 = vmatmul.mubr.msk.f32.vlgmr.msra.gmra.mrb[0].mxu1 %vm185_vm0, %v180_v6  ;;  %581 = vmatprep.mubr.msk.f32.mxu0 %vm185_vm0, %v177_v7  ;;  %v182_v10 = vld [vmem:[%s172_s7 + $0x38] sm:$0xff] }
  0x1c   : > { %587 = vmatprep.mubr.msk.f32.mxu1 %vm185_vm0, %v181_v8 }
  0x1e   : > { %582 = vmatmul.mubr.msk.f32.gmra.mrb[2].mxu0 %vm185_vm0, %v178_v9 }
  0x1f   : > { %588 = vmatmul.mubr.msk.f32.gmra.mrb[2].mxu1 %vm185_vm0, %v182_v10 }
  0xed   : > { %v580_v15 = vpop.f32.mrb[0].mxu0 }
  0xee   : > { %v586_v16 = vpop.f32.mrb[0].mxu1  ;;  %317 = vst.msk [vmem:[#allocation2 + $0x8] sm:$0xff] %vm315_vm1, %v580_v15  ;;  %v276_v17 = vpop.f32.mrb[1].mxu0 }
  0xef   : > { %321 = vst.msk [vmem:[#allocation2 + $0x28] sm:$0xff] %vm315_vm1, %v586_v16  ;;  %v296_v18 = vpop.f32.mrb[1].mxu1  ;;  %316 = vst.msk [vmem:[#allocation2] sm:$0xff] %vm315_vm1, %v276_v17 }
  0xf0   : > { %320 = vst.msk [vmem:[#allocation2 + $0x20] sm:$0xff] %vm315_vm1, %v296_v18 }
  0xf1   : > { %v583_v19 = vpop.f32.mrb[2].mxu0 }
  0xf2   : > { %v589_v20 = vpop.f32.mrb[2].mxu1  ;;  %319 = vst.msk [vmem:[#allocation2 + $0x18] sm:$0xff] %vm315_vm1, %v583_v19  ;;  %v286_v21 = vpop.f32.mrb[3].mxu0 }
  0xf3   : > { %323 = vst.msk [vmem:[#allocation2 + $0x38] sm:$0xff] %vm315_vm1, %v589_v20  ;;  %v306_v22 = vpop.f32.mrb[3].mxu1  ;;  %318 = vst.msk [vmem:[#allocation2 + $0x10] sm:$0xff] %vm315_vm1, %v286_v21 }
  0xf4   : > { %322 = vst.msk [vmem:[#allocation2 + $0x30] sm:$0xff] %vm315_vm1, %v306_v22 }
  0xf5 LB: >> { %594 = vmatprep.mubr.msk.f32.mxu0 %vm185_vm0, %v324_v11  ;;  %597 = vmatprep.mubr.msk.f32.mxu1 %vm185_vm0, %v326_v13  ;;  %s543_s28 = sshll.u32 %s731_s27, 4  ;;  %s548_s4 = sshll.u32 %s731_s27, 5  ;;  %s731_s27 = sphi %s848_s27, %s333_s27  }
  0xf6   : >> { %s335_s29 = scalar_lea.vmem [#allocation2], %s543_s28  ;;  %s436_s5 = scalar_lea.vmem %s166_s26, %s548_s4 [#allocation3] }
  0xf7   : >> { %s333_s27 = sadd.s32 1, %s731_s27  }
  0xf8   : >> { %p330_p11 = scmp.ge.s32.totalorder %s333_s27, 4  }
  0xf9   : > { %s557_s6 = sshll.u32 (%p330_p11), %s777_s16, 11  ;;  %s456_s10 = sshll.u32 (%p330_p11), %s166_s26, 4  ;;  %s871_s10 = int_to_ptr.vmem [resolvable:$true] %s456_s10 }
  0xfa   : > { %s867_s9 = scalar_lea.hbm (%p330_p11), %s919_s3, %s557_s6  ;;  %s875_s11 = scalar_lea.sflag (%p330_p11), [#allocation4], %s164_s24 }
  0xfb   : >> { %v336_v23 = vld [vmem:[%s335_s29] sm:$0xff]  ;;  %v337_v24 = vld [vmem:[%s335_s29 + $0x8] sm:$0xff]  ;;  %s661_s17 = scalar_lea.vmem (%p330_p11), %s871_s10, 2048  ;;  %s733_s16 = smov (%p330_p11), [#allocation3]  }
  0xfc   : >> { %v604_v25 = vpack.c.bf16 %v337_v24, %v336_v23  ;;  %p662_p12 = scmp.ne.s32.totalorder (%p330_p11), %s871_s10, %s661_s17  ;;  %s665_s19 = sshll.u32 (%p330_p11), %s733_s16, 4  ;;  %s666_s19 = int_to_ptr.vmem [resolvable:$false] %s665_s19 }
  0xfd   : > { %s667_s20 = scalar_lea.vmem (%p330_p11), %s666_s19, 4096  ;;  %p668_p1 = scmp.lt.s32.totalorder (%p330_p11), %s871_s10, %s666_s19 }
  0xfe   : >> { %605 = vmatprep.subr.bf16.mxu0 %v604_v25  ;;  %610 = vmatprep.subr.bf16.mxu1 %v604_v25  ;;  %p663_p13 = pnand (%p330_p11), %p662_p12, %p794_p5  ;;  %p669_p2 = scmp.lt.s32.totalorder (%p330_p11), %s667_s20, %s661_s17 }
  0xff   : >> { %607 = vmatpush3.bf16.msra.mxu0 %v604_v25  ;;  %611 = vmatpush3.bf16.msra.mxu1 %v604_v25 }
 0x100   : > { %p664_p0 = pneg (%p330_p11), %p663_p13  ;;  %p670_p3 = por (%p330_p11), %p669_p2, %p668_p1 }
 0x102   : >> { %595 = vmatmul.mubr.msk.f32.vlgmr.msra.gmra.mrb[0].mxu0 %vm185_vm0, %v325_v12  ;;  %598 = vmatmul.mubr.msk.f32.vlgmr.msra.gmra.mrb[0].mxu1 %vm185_vm0, %v327_v14  ;;  %p671_p4 = pnand (%p330_p11), %p670_p3, %p664_p0 }
 0x1d1   : > { %332 = sbr.rel (!%p330_p11) target bundleno = 245 (0xf5), region = 76 }
 0x1d5   : >> { %v596_v26 = vpop.f32.mrb[0].mxu0  ;;  %v599_v27 = vpop.f32.mrb[0].mxu1 }
 0x1d6   : >> { %438 = vst.msk [vmem:[%s436_s5 + $0x8] sm:$0xff] %vm315_vm1, %v596_v26  ;;  %440 = vst.msk [vmem:[%s436_s5 + $0x18] sm:$0xff] %vm315_vm1, %v599_v27  ;;  %v416_v28 = vpop.f32.mrb[1].mxu0  ;;  %v426_v29 = vpop.f32.mrb[1].mxu1 }
 0x1d7   : >> { %437 = vst.msk [vmem:[%s436_s5] sm:$0xff] %vm315_vm1, %v416_v28  ;;  %439 = vst.msk [vmem:[%s436_s5 + $0x10] sm:$0xff] %vm315_vm1, %v426_v29 }
 0x1d8   : > { %674 = shalt.err (!%p671_p4)
}
 0x1d9   : > { %s675_s24 = scalar_lea.hbm %s867_s9, 2048  ;;  %s679_s26 = scalar_lea.hbm %s919_s3, 4096 }
 0x1da   : > { %p676_p7 = scmp.ne.s32.totalorder %s867_s9, %s675_s24  ;;  %p680_p10 = scmp.lt.u32.totalorder %s867_s9, %s919_s3 }
 0x1db   : > { %p681_p11 = scmp.lt.u32.totalorder %s679_s26, %s675_s24  ;;  %p683_p13 = scmp.lt.u32.totalorder %s675_s24, %s867_s9 }
 0x1dc   : > { %p677_p8 = pnand %p676_p7, %p794_p5 }
 0x1dd   : > { %p682_p12 = por %p681_p11, %p680_p10 }
 0x1de   : > { %p678_p9 = pneg %p677_p8 }
 0x1df   : > { %p684_p0 = por %p683_p13, %p682_p12 }
 0x1e1   : > { %p685_p1 = pnand %p684_p0, %p678_p9 }
 0x1e3   : > { %688 = shalt.err (!%p685_p1)
}
 0x1e4   : > { %s734_s29 = smov 128   ;;  %s735_s4 = smov 8  }
 0x1e5   : > { %612 = dma.vmem_to_hbm [thread:$0]  (%p794_p5), %s871_s10, 2048, %s867_s9, %s875_s11, %s734_s29, %s734_s29, %s735_s4  }
 0x1e6 PF: > { %p618_p2 = scmp.ge.s32.totalorder %s727_s15, 2  ;;  %s471_s5 = sand.u32 1, %s715_s12  }
 0x1e7   : > { %s472_s6 = scalar_lea.sflag [#allocation4], %s471_s5 }
 0x1e8   : > { %p615_p3 = pnand %p618_p2, %p798_p6 }
 0x1ea   : > { %710 = dma.done.wait (!%p615_p3), %s472_s6, 2048  }
 0x1eb   : > { %712 = vsyncadd (!%p615_p3), %s472_s6, 4294965248  ;;  %p13_p4 = scmp.ge.s32.totalorder %s781_s18, 4   ;;  %s922_s12 = smov %s719_s13 }
 0x1ec   : > { %s923_s13 = smov %s723_s14  ;;  %s924_s14 = smov %s792_s21 }
 0x1ed   : > { %s925_s15 = smov %s781_s18  ;;  %15 = sbr.rel (!%p13_p4) target bundleno = 3 (0x3), region = 87 }
 0x1f4   :  { %477 = vsyncpa [#allocation4], 1 }
 0x1f5   :  { %479 = vsyncpa [#allocation4 + $0x1], 1 }

</bundles_post_ra>
